<compile_context>
chip_gen: v7x
topology: tpu7x:2x2x1
jax: 0.10.0
libtpu: 0.0.40
codegen_flags: <defaults>
</compile_context>

<pallas_src>
import jax
import jax.numpy as jnp
from jax.experimental import pallas as pl
from jax.experimental.pallas import tpu as pltpu


def attention_kernel(x_ref, m_ref, w_ref, b_ref, out_ref, atts_ref):
    # x_ref:    (TB, S, H)  batch-tile of inputs                (VMEM)
    # m_ref:    (TB, S)     lane-dense mask                     (VMEM)
    # w_ref:    (1, H)      folded proj->head weight row        (VMEM)
    # b_ref:    (1, 1)      folded scalar bias                  (SMEM)
    # out_ref:  (TB, H)     pooled output
    # atts_ref: (TB, S)     attention weights (lane-dense)
    x = x_ref[...]                      # (TB, S, H)
    m = m_ref[...]                      # (TB, S)
    w = w_ref[...]                      # (1, H)
    b = b_ref[0, 0]                     # scalar

    # Folded linear: logits = x @ w_comb + b_comb, done on the VPU
    # (elementwise multiply + cross-lane reduce over H). No MXU N=1 matmul.
    logits = jnp.sum(x * w[None], axis=-1) + b          # (TB, S)

    # Masking exactly as in the PyTorch module.
    neg_inf = jnp.float32(-1e9)
    logits = logits * m + (1.0 - m) * neg_inf

    # Softmax over the sequence (lane) axis, max-shifted.
    lmax = jnp.max(logits, axis=-1, keepdims=True)       # (TB, 1)
    e = jnp.exp(logits - lmax)                            # (TB, S)
    denom = jnp.sum(e, axis=-1, keepdims=True)            # (TB, 1)
    atts = e * pl.reciprocal(denom, approx=False)         # (TB, S)
    atts = atts * m

    atts_ref[...] = atts                                   # lane-dense store

    # Weighted pooling: sum over seq of x * atts (VPU mul + sublane reduce).
    out_ref[...] = jnp.sum(x * atts[:, :, None], axis=1)   # (TB, H)


def attention_forward(inputs, masks, w_proj, b_proj, w_head, b_head, *, tb=64):
    """inputs: (B, S, H); masks: (B, S, 1).
    w_proj: (H, H) nn.Linear weight (out, in); b_proj: (H,)
    w_head: (1, H) nn.Linear weight (out, in); b_head: (1,)
    Returns: output (B, H), atts (B, S)."""
    B, S, H = inputs.shape

    x = inputs.astype(jnp.float32)
    m = masks.astype(jnp.float32).reshape(B, S)            # lane-dense mask

    wp = jnp.asarray(w_proj, jnp.float32)                  # (H, H) (out, in)
    bp = jnp.asarray(b_proj, jnp.float32)                  # (H,)
    wh = jnp.asarray(w_head, jnp.float32)                  # (1, H)
    bh = jnp.asarray(b_head, jnp.float32)                  # (1,)

    # Fold the two linears (no nonlinearity in between):
    #   logits = (x @ wp.T + bp) @ wh.T + bh = x @ (wp.T @ wh.T) + (bp @ wh.T + bh)
    w_comb = (wp.T @ wh.T).reshape(1, H)                   # (1, H)
    b_comb = (bp @ wh.T + bh).reshape(1, 1)                # (1, 1) scalar

    tb = min(tb, B)
    grid = (pl.cdiv(B, tb),)

    cost = pl.CostEstimate(
        flops=4 * B * S * H + 8 * B * S,
        transcendentals=B * S,
        bytes_accessed=4 * (B * S * H + 2 * B * S + B * H + H + 1),
    )

    out, atts = pl.pallas_call(
        attention_kernel,
        out_shape=(
            jax.ShapeDtypeStruct((B, H), jnp.float32),
            jax.ShapeDtypeStruct((B, S), jnp.float32),
        ),
        grid_spec=pltpu.PrefetchScalarGridSpec(
            num_scalar_prefetch=0,
            grid=grid,
            in_specs=[
                pl.BlockSpec((tb, S, H), lambda b: (b, 0, 0)),   # inputs
                pl.BlockSpec((tb, S), lambda b: (b, 0)),         # mask (lane-dense)
                pl.BlockSpec((1, H), lambda b: (0, 0)),          # folded weight row
                pl.BlockSpec(memory_space=pltpu.MemorySpace.SMEM),  # folded bias
            ],
            out_specs=[
                pl.BlockSpec((tb, H), lambda b: (b, 0)),         # pooled output
                pl.BlockSpec((tb, S), lambda b: (b, 0)),         # atts (lane-dense)
            ],
        ),
        compiler_params=pltpu.CompilerParams(
            dimension_semantics=("parallel",)),
        cost_estimate=cost,
    )(x, m, w_comb, b_comb)

    return out, atts


def attention_ref(inputs, masks, w_proj, b_proj, w_head, b_head):
    """Pure-JAX reference mirroring the PyTorch forward."""
    proj = inputs @ w_proj.T + b_proj
    logits = proj @ w_head.T + b_head                      # (B, S, 1)
    neg_inf = -1e9
    logits = logits * masks + (1.0 - masks) * neg_inf
    atts = jax.nn.softmax(logits, axis=1)
    atts = atts * masks
    out = jnp.sum(inputs * atts, axis=1)
    return out, jnp.squeeze(atts, axis=-1)


if __name__ == "__main__":
    B, S, H = 2, 8, 32
    key = jax.random.PRNGKey(0)
    k1, k2, k3, k4, k5, _ = jax.random.split(key, 6)

    inputs = jax.random.normal(k1, (B, S, H), dtype=jnp.float32)
    # binary mask: first batch fully valid, second has last 3 positions masked
    lengths = jnp.array([S, S - 3])
    masks = (jnp.arange(S)[None, :] < lengths[:, None]).astype(jnp.float32)[..., None]

    # nn.Linear-shaped parameters: weight (out, in), bias (out,)
    w_proj = jax.random.normal(k2, (H, H), dtype=jnp.float32) * 0.1
    b_proj = jax.random.normal(k3, (H,), dtype=jnp.float32) * 0.1
    w_head = jax.random.normal(k4, (1, H), dtype=jnp.float32) * 0.1
    b_head = jax.random.normal(k5, (1,), dtype=jnp.float32) * 0.1

    out, atts = attention_forward(inputs, masks, w_proj, b_proj, w_head, b_head)
    out = jax.block_until_ready(out)
    atts = jax.block_until_ready(atts)

    out_ref, atts_ref = attention_ref(inputs, masks, w_proj, b_proj, w_head, b_head)
    assert out.shape == (B, H) and atts.shape == (B, S)
    assert jnp.allclose(out, out_ref, atol=1e-4, rtol=1e-4)
    assert jnp.allclose(atts, atts_ref, atol=2e-5, rtol=1e-4)

    print("KERNEL_OK")
</pallas_src>

<mosaic_0001>
module attributes {stable_mosaic.version = 11 : i64} {
  func.func @attention_kernel(%arg0: i32, %arg1: memref<2x8x32xf32, #tpu.memory_space<vmem>>, %arg2: memref<2x8xf32, #tpu.memory_space<vmem>>, %arg3: memref<1x32xf32, #tpu.memory_space<vmem>>, %arg4: memref<1x1xf32, #tpu.memory_space<smem>>, %arg5: memref<2x32xf32, #tpu.memory_space<vmem>>, %arg6: memref<2x8xf32, #tpu.memory_space<vmem>>) attributes {dimension_semantics = [#tpu.dimension_semantics<parallel>], iteration_bounds = array<i64: 1>, scalar_prefetch = 0 : i64, scratch_operands = 0 : i64, tpu.core_type = #tpu.core_type<tc>, window_params = [{transform_indices = @transform_0, window_bounds = array<i64: 2, 8, 32>}, {transform_indices = @transform_1, window_bounds = array<i64: 2, 8>}, {pipeline_mode = #tpu.pipeline_mode<synchronous>, transform_indices = @transform_2, window_bounds = array<i64: 1, 32>}, {transform_indices = @transform_3, window_bounds = array<i64: 1, 1>}, {transform_indices = @transform_4, window_bounds = array<i64: 2, 32>}, {transform_indices = @transform_5, window_bounds = array<i64: 2, 8>}]} {
    %c0 = arith.constant 0 : index
    %c0_0 = arith.constant 0 : index
    %c0_1 = arith.constant 0 : index
    %0 = vector.load %arg1[%c0, %c0_0, %c0_1] : memref<2x8x32xf32, #tpu.memory_space<vmem>>, vector<2x8x32xf32>
    %c0_2 = arith.constant 0 : index
    %c0_3 = arith.constant 0 : index
    %1 = vector.load %arg2[%c0_2, %c0_3] : memref<2x8xf32, #tpu.memory_space<vmem>>, vector<2x8xf32>
    %c0_4 = arith.constant 0 : index
    %c0_5 = arith.constant 0 : index
    %2 = vector.load %arg3[%c0_4, %c0_5] : memref<1x32xf32, #tpu.memory_space<vmem>>, vector<1x32xf32>
    %c0_6 = arith.constant 0 : index
    %c0_7 = arith.constant 0 : index
    %3 = memref.load %arg4[%c0_6, %c0_7] : memref<1x1xf32, #tpu.memory_space<smem>>
    %4 = vector.shape_cast %2 : vector<1x32xf32> to vector<1x1x32xf32>
    %5 = vector.broadcast %4 : vector<1x1x32xf32> to vector<2x8x32xf32>
    %6 = arith.mulf %0, %5 : vector<2x8x32xf32>
    %cst = arith.constant dense<0.000000e+00> : vector<2x8xf32>
    %7 = vector.multi_reduction <add>, %6, %cst [2] : vector<2x8x32xf32> to vector<2x8xf32>
    %8 = vector.broadcast %3 : f32 to vector<2x8xf32>
    %9 = arith.addf %7, %8 : vector<2x8xf32>
    %10 = arith.mulf %9, %1 : vector<2x8xf32>
    %cst_8 = arith.constant 1.000000e+00 : f32
    %11 = vector.broadcast %cst_8 : f32 to vector<2x8xf32>
    %12 = arith.subf %11, %1 : vector<2x8xf32>
    %cst_9 = arith.constant -1.000000e+09 : f32
    %13 = vector.broadcast %cst_9 : f32 to vector<2x8xf32>
    %14 = arith.mulf %12, %13 : vector<2x8xf32>
    %15 = arith.addf %10, %14 : vector<2x8xf32>
    %cst_10 = arith.constant dense<0xFF800000> : vector<2xf32>
    %16 = vector.multi_reduction <maximumf>, %15, %cst_10 [1] : vector<2x8xf32> to vector<2xf32>
    %17 = vector.shape_cast %16 : vector<2xf32> to vector<2x1xf32>
    %18 = vector.broadcast %17 : vector<2x1xf32> to vector<2x8xf32>
    %19 = arith.subf %15, %18 : vector<2x8xf32>
    %20 = math.exp %19 : vector<2x8xf32>
    %cst_11 = arith.constant dense<0.000000e+00> : vector<2xf32>
    %21 = vector.multi_reduction <add>, %20, %cst_11 [1] : vector<2x8xf32> to vector<2xf32>
    %22 = vector.shape_cast %21 : vector<2xf32> to vector<2x1xf32>
    %23 = tpu.reciprocal %22 : vector<2x1xf32> -> vector<2x1xf32>
    %24 = vector.broadcast %23 : vector<2x1xf32> to vector<2x8xf32>
    %25 = arith.mulf %20, %24 : vector<2x8xf32>
    %26 = arith.mulf %25, %1 : vector<2x8xf32>
    %c0_12 = arith.constant 0 : index
    %c0_13 = arith.constant 0 : index
    %27 = vector.load %arg6[%c0_12, %c0_13] : memref<2x8xf32, #tpu.memory_space<vmem>>, vector<2x8xf32>
    tpu.vector_store %arg6[%c0_12, %c0_13], %26 {strides = array<i32>} : memref<2x8xf32, #tpu.memory_space<vmem>>, vector<2x8xf32>,
    %28 = vector.shape_cast %26 : vector<2x8xf32> to vector<2x8x1xf32>
    %29 = vector.broadcast %28 : vector<2x8x1xf32> to vector<2x8x32xf32>
    %30 = arith.mulf %0, %29 : vector<2x8x32xf32>
    %cst_14 = arith.constant dense<0.000000e+00> : vector<2x32xf32>
    %31 = vector.multi_reduction <add>, %30, %cst_14 [1] : vector<2x8x32xf32> to vector<2x32xf32>
    %c0_15 = arith.constant 0 : index
    %c0_16 = arith.constant 0 : index
    %32 = vector.load %arg5[%c0_15, %c0_16] : memref<2x32xf32, #tpu.memory_space<vmem>>, vector<2x32xf32>
    tpu.vector_store %arg5[%c0_15, %c0_16], %31 {strides = array<i32>} : memref<2x32xf32, #tpu.memory_space<vmem>>, vector<2x32xf32>,
    return
  }
  func.func @transform_0(%arg0: i32) -> (i32, i32, i32) {
    %c0_i32 = arith.constant 0 : i32
    %c0_i32_0 = arith.constant 0 : i32
    %c0_i32_1 = arith.constant 0 : i32
    return %arg0, %c0_i32, %c0_i32_0 : i32, i32, i32
  }
  func.func @transform_1(%arg0: i32) -> (i32, i32) {
    %c0_i32 = arith.constant 0 : i32
    %c0_i32_0 = arith.constant 0 : i32
    return %arg0, %c0_i32 : i32, i32
  }
  func.func @transform_2(%arg0: i32) -> (i32, i32) {
    %c0_i32 = arith.constant 0 : i32
    %c0_i32_0 = arith.constant 0 : i32
    %c0_i32_1 = arith.constant 0 : i32
    return %c0_i32, %c0_i32_0 : i32, i32
  }
  func.func @transform_3(%arg0: i32) -> (i32, i32) {
    %c0_i32 = arith.constant 0 : i32
    %c0_i32_0 = arith.constant 0 : i32
    %c0_i32_1 = arith.constant 0 : i32
    return %c0_i32, %c0_i32_0 : i32, i32
  }
  func.func @transform_4(%arg0: i32) -> (i32, i32) {
    %c0_i32 = arith.constant 0 : i32
    %c0_i32_0 = arith.constant 0 : i32
    return %arg0, %c0_i32 : i32, i32
  }
  func.func @transform_5(%arg0: i32) -> (i32, i32) {
    %c0_i32 = arith.constant 0 : i32
    %c0_i32_0 = arith.constant 0 : i32
    return %arg0, %c0_i32 : i32, i32
  }
}

</mosaic_0001>

<bundles_post_ra>
// kernel: tpu_custom_call.1
= control target key start
LH: loop header
LB: loop body
LE: loop exit
PB: predicated region body
PF: predicated region fallthrough
CT: control target
= control target key end

     0   :  { %12 = vsyncpa [#allocation4], 0  ;;  %s457_s0 = inlined_call_operand.hbm [shape: f32[2,8,32], index: 0, kind: input, shape index: {}]   ;;  %s458_s1 = inlined_call_operand.vmem [shape: f32[2,8], index: 1, kind: input, shape index: {}]   ;;  %s459_s2 = inlined_call_operand.vmem [shape: f32[1,32], index: 2, kind: input, shape index: {}]   ;;  %s460_s3 = inlined_call_operand.<no memory space> [shape: f32[1,1], index: 3, kind: input, shape index: {}]   ;;  %s461_s4 = inlined_call_operand.hbm [shape: f32[2,32], index: 4, kind: output, shape index: {0}]   ;;  %s462_s5 = inlined_call_operand.hbm [shape: f32[2,8], index: 5, kind: output, shape index: {1}]  }
   0x1   :  { %13 = vsyncpa [#allocation5], 0 }
   0x2   :  { %14 = vsyncpa [#allocation8], 0  ;;  %s337_s18 = smov [#allocation3]   ;;  %s265_s22 = scalar_lea.hbm %s457_s0, 256 }
   0x3   :  { %s20_s19 = sshll.u32 %s337_s18, 4  ;;  %p266_p0 = scmp.ne.s32.totalorder %s457_s0, %s265_s22  ;;  %s21_s19 = int_to_ptr.vmem [resolvable:$true] %s20_s19 }
   0x4   :  { %p269_p1 = scmp.lt.u32.totalorder %s265_s22, %s457_s0 }
   0x6   :  { %p271_p2 = pnand %p269_p1, %p266_p0 }
   0x8   :  { %274 = shalt.err (!%p271_p2)
}
   0x9   :  { %s275_s27 = scalar_lea.vmem %s21_s19, 256  ;;  %p280_p4 = scmp.lt.s32.totalorder %s21_s19, %s21_s19 }
   0xa   :  { %p276_p3 = scmp.ne.s32.totalorder %s21_s19, %s275_s27  ;;  %p281_p5 = scmp.lt.s32.totalorder %s275_s27, %s275_s27 }
   0xc   :  { %p282_p6 = por %p281_p5, %p280_p4 }
   0xe   :  { %p283_p7 = pnand %p282_p6, %p276_p3 }
  0x10   :  { %286 = shalt.err (!%p283_p7)
}
  0x11   :  { %s338_s28 = smov 128   ;;  %s339_s29 = smov 8  }
  0x12   :  { %26 = dma.hbm_to_vmem [thread:$0]  %s457_s0, 256, %s21_s19, [#allocation4], %s338_s28, %s338_s28, %s339_s29  }
  0x13   :  { %331 = dma.done.wait [#allocation4], 256  }
  0x14   :  { %332 = vsyncadd [#allocation4], 4294967040  ;;  %v60_v0 = vlaneseq  ;;  %v389_v5 = vld [vmem:[#allocation3] sm:$0xff]  ;;  %vm49_vm0 = vcmask 261120   ;;  %v394_v7 = vld [vmem:[#allocation3 + $0x8] sm:$0xff]  ;;  %v340_v20 = vmov 0   ;;  %v56_v22 = vstv %s460_s3 }
  0x15   :  { %v250_v6 = vld [vmem:[%s459_s2] ss:$0 sm:$0xff]  ;;  %257 = vset.pattern.permute.xlu1 %v340_v20  ;;  %258 = vset.pattern.permute.xlu0 %v340_v20  ;;  %vm117_vm1 = vcmask 1041409   ;;  %vm120_vm2 = vcmask 58368   ;;  %s341_s3 = smov [#allocation7]  }
  0x16   :  { %v61_v1 = vshrl.u32 %v60_v0, 7  ;;  %v108_v2 = vand.u32 127, %v60_v0  ;;  %v47_v9 = vmul.f32 %v250_v6, %v389_v5  ;;  %v48_v10 = vmul.f32 %v250_v6, %v394_v7  ;;  %v38_v11 = vld [vmem:[%s458_s1] sm:$0x3]  ;;  %s237_s10 = sshll.u32 %s341_s3, 4  ;;  %s238_s10 = int_to_ptr.vmem [resolvable:$true] %s237_s10 }
  0x17   :  { %v78_v13 = vsub.f32 1.0, %v38_v11  ;;  %s287_s11 = scalar_lea.vmem %s238_s10, 32  ;;  %p292_p9 = scmp.lt.s32.totalorder %s238_s10, %s238_s10 }
  0x18   :  { %v385_v3 = vsub.s32 %v108_v2, %v61_v1  ;;  %v387_v4 = vsub.s32 0, %v61_v1  ;;  %v396_v8 = vsub.s32 1, %v61_v1  ;;  %v50_v14 = vsel %vm49_vm0, %v47_v9, 0.0  ;;  %p288_p8 = scmp.ne.s32.totalorder %s238_s10, %s287_s11  ;;  %p293_p10 = scmp.lt.s32.totalorder %s287_s11, %s287_s11 }
  0x19   :  { %51 = vadd.xlane.f32.xlu0 %v50_v14  ;;  %v79_v16 = vmul.f32 -1e+09, %v78_v13  ;;  %v53_v17 = vsel %vm49_vm0, %v48_v10, 0.0 }
  0x1a   :  { %v63_v12 = vrot.slane %v38_v11, %v387_v4  ;;  %v70_v15 = vrot.slane %v38_v11, %v396_v8  ;;  %p294_p11 = por %p293_p10, %p292_p9 }
  0x1b   :  { %v91_v18 = vrot.slane %v79_v16, %v396_v8  ;;  %v84_v19 = vrot.slane %v79_v16, %v387_v4 }
  0x1c   :  { %65 = vbcast.lane.b32.xlu1 %v63_v12, 256  ;;  %p295_p12 = pnand %p294_p11, %p288_p8 }
  0x1d   :  { %54 = vadd.xlane.f32.xlu0 %v53_v17 }
  0x20   :  { %72 = vbcast.lane.b32.xlu1 %v70_v15, 256 }
  0x24   :  { %93 = vbcast.lane.b32.xlu1 %v91_v18, 256 }
  0x33   :  { %86 = vbcast.lane.b32.xlu0 %v84_v19, 256 }
  0x8e   :  { %v66_v21 = vpop.permute.xlu1 %65 }
  0x92   :  { %v73_v25 = vpop.permute.xlu1 %72 }
  0x96   :  { %v94_v32 = vpop.permute.xlu1 %93 }
  0xa6   :  { %v52_v23 = vpop.xlane.xlu0 %51 }
  0xa7   :  { %v57_v24 = vadd.f32 %v56_v22, %v52_v23 }
  0xa9   :  { %v76_v28 = vmul.f32 %v66_v21, %v57_v24 }
  0xaa   :  { %v55_v26 = vpop.xlane.xlu0 %54 }
  0xab   :  { %v58_v27 = vadd.f32 %v56_v22, %v55_v26 }
  0xad   :  { %v77_v30 = vmul.f32 %v73_v25, %v58_v27 }
  0xae   :  { %v87_v29 = vpop.permute.xlu0 %86 }
  0xaf   :  { %v97_v31 = vadd.f32 %v87_v29, %v76_v28  ;;  %v98_v33 = vadd.f32 %v94_v32, %v77_v30 }
  0xb1   :  { %102 = vperm.xlu1 %257, %v97_v31  }
  0xb5   :  { %105 = vperm.xlu1 %257, %v98_v33  }
 0x130   :  { %v103_v34 = vpop.permute.xlu1 %102 }
 0x131   :  { %v112_v36 = vrot.slane %v103_v34, %v385_v3 }
 0x134   :  { %v106_v35 = vpop.permute.xlu1 %105 }
 0x135   :  { %v116_v37 = vrot.slane %v106_v35, %v385_v3 }
 0x137   :  { %v118_v38 = vsel %vm117_vm1, %v116_v37, %v112_v36 }
 0x138   :  { %v121_v39 = vsel %vm120_vm2, %v118_v38, -inf }
 0x139   :  { %122 = vmax.xlane.f32.xlu1 %v121_v39 }
 0x1c6   :  { %v123_v40 = vpop.xlane.xlu1 %122 }
 0x1c7   :  { %v128_v41 = vrot.slane %v123_v40, %v387_v4  ;;  %v132_v42 = vrot.slane %v123_v40, %v396_v8 }
 0x1c9   :  { %v135_v43 = vsub.f32 %v97_v31, %v128_v41  ;;  %v136_v44 = vsub.f32 %v98_v33, %v132_v42 }
 0x1cb   :  { %v137_v45 = vmul.f32 1.442695, %v135_v43  ;;  %v139_v46 = vmul.f32 1.442695, %v136_v44 }
 0x1cd   :  { %259 = vpow2.f32 %v137_v45 }
 0x1ce   :  { %261 = vpow2.f32 %v139_v46 }
 0x1d7   :  { %v260_v47 = vpop.eup %259 }
 0x1d8   :  { %144 = vperm.xlu0 %258, %v260_v47   ;;  %v262_v48 = vpop.eup %261 }
 0x1dc   :  { %147 = vperm.xlu0 %258, %v262_v48  }
 0x257   :  { %v145_v49 = vpop.permute.xlu0 %144 }
 0x258   :  { %v152_v51 = vrot.slane %v145_v49, %v385_v3 }
 0x25b   :  { %v148_v50 = vpop.permute.xlu0 %147 }
 0x25c   :  { %v156_v52 = vrot.slane %v148_v50, %v385_v3 }
 0x25e   :  { %v157_v53 = vsel %vm117_vm1, %v156_v52, %v152_v51 }
 0x25f   :  { %v159_v54 = vsel %vm120_vm2, %v157_v53, 0.0 }
 0x260   :  { %160 = vadd.xlane.f32.xlu0 %v159_v54 }
 0x2ed   :  { %v161_v55 = vpop.xlane.xlu0 %160 }
 0x2ee   :  { %263 = vrcp.f32 %v161_v55 }
 0x2f8   :  { %v264_v56 = vpop.eup %263 }
 0x2f9   :  { %v171_v57 = vrot.slane %v264_v56, %v396_v8  ;;  %v167_v58 = vrot.slane %v264_v56, %v387_v4 }
 0x2fb   :  { %v175_v59 = vmul.f32 %v262_v48, %v171_v57  ;;  %v174_v60 = vmul.f32 %v260_v47, %v167_v58 }
 0x2fd   :  { %v177_v61 = vmul.f32 %v175_v59, %v73_v25  ;;  %v176_v62 = vmul.f32 %v174_v60, %v66_v21 }
 0x2ff   :  { %184 = vperm.xlu0 %258, %v177_v61   ;;  %181 = vperm.xlu1 %257, %v176_v62  }
 0x37e   :  { %v185_v63 = vpop.permute.xlu0 %184  ;;  %v182_v0 = vpop.permute.xlu1 %181 }
 0x37f   :  { %v193_v1 = vrot.slane %v185_v63, %v385_v3  ;;  %v200_v2 = vmul.f32 %v185_v63, %v394_v7  ;;  %v189_v6 = vrot.slane %v182_v0, %v385_v3  ;;  %v199_v8 = vmul.f32 %v182_v0, %v389_v5 }
 0x381   :  { %v208_v4 = vsel %vm49_vm0, %v200_v2, 0.0  ;;  %v201_v9 = vsel %vm49_vm0, %v199_v8, 0.0  ;;  %v194_v10 = vsel %vm117_vm1, %v193_v1, %v189_v6 }
 0x382   :  { %v209_v11 = vrot.slane %v208_v4, 4  ;;  %v202_v12 = vrot.slane %v201_v9, 4  ;;  %196 = vst.msk [vmem:[#allocation7] sm:$0x3] %vm120_vm2, %v194_v10 }
 0x383   :  { %298 = shalt.err (!%p295_p12)
}
 0x384   :  { %s299_s14 = scalar_lea.hbm %s462_s5, 32 }
 0x385   :  { %p300_p13 = scmp.ne.s32.totalorder %s462_s5, %s299_s14  ;;  %p303_p0 = scmp.lt.u32.totalorder %s299_s14, %s462_s5 }
 0x387   :  { %p305_p1 = pnand %p303_p0, %p300_p13 }
 0x389   :  { %308 = shalt.err (!%p305_p1)
}
 0x38a   :  { %240 = dma.vmem_to_hbm [thread:$0]  %s238_s10, 32, %s462_s5, [#allocation8]   ;;  %v210_v3 = vadd.f32 %v209_v11, %v208_v4  ;;  %v203_v5 = vadd.f32 %v202_v12, %v201_v9  ;;  %vm219_vm3 = vcmask 254976  }
 0x38b   :  { %s342_s21 = smov [#allocation6]  }
 0x38c   :  { %v211_v7 = vrot.slane %v210_v3, 2  ;;  %v204_v13 = vrot.slane %v203_v5, 2  ;;  %s227_s22 = sshll.u32 %s342_s21, 4  ;;  %s228_s22 = int_to_ptr.vmem [resolvable:$true] %s227_s22 }
 0x38d   :  { %s309_s23 = scalar_lea.vmem %s228_s22, 32  ;;  %p314_p3 = scmp.lt.s32.totalorder %s228_s22, %s228_s22 }
 0x38e   :  { %v212_v14 = vadd.f32 %v211_v7, %v210_v3  ;;  %v205_v15 = vadd.f32 %v204_v13, %v203_v5  ;;  %p310_p2 = scmp.ne.s32.totalorder %s228_s22, %s309_s23  ;;  %p315_p4 = scmp.lt.s32.totalorder %s309_s23, %s309_s23 }
 0x390   :  { %v213_v16 = vrot.slane %v212_v14, 1  ;;  %v206_v17 = vrot.slane %v205_v15, 1  ;;  %p316_p5 = por %p315_p4, %p314_p3 }
 0x392   :  { %v214_v18 = vadd.f32 %v213_v16, %v212_v14  ;;  %v207_v19 = vadd.f32 %v206_v17, %v205_v15  ;;  %p317_p6 = pnand %p316_p5, %p310_p2 }
 0x394   :  { %v217_v20 = vsel %vm117_vm1, %v214_v18, %v207_v19 }
 0x395   :  { %220 = vst.msk [vmem:[#allocation6] sm:$0x3] %vm219_vm3, %v217_v20 }
 0x396   :  { %320 = shalt.err (!%p317_p6)
}
 0x397   :  { %s321_s25 = scalar_lea.hbm %s461_s4, 32 }
 0x398   :  { %p322_p7 = scmp.ne.s32.totalorder %s461_s4, %s321_s25  ;;  %p325_p8 = scmp.lt.u32.totalorder %s321_s25, %s461_s4 }
 0x39a   :  { %p327_p9 = pnand %p325_p8, %p322_p7 }
 0x39c   :  { %330 = shalt.err (!%p327_p9)
}
 0x39d   :  { %230 = dma.vmem_to_hbm [thread:$0]  %s228_s22, 32, %s461_s4, [#allocation5]  }
 0x39e   :  { %333 = dma.done.wait [#allocation5], 32  }
 0x39f   :  { %334 = vsyncadd [#allocation5], 4294967264 }
 0x3a0   :  { %335 = dma.done.wait [#allocation8], 32  }
 0x3a1   :  { %336 = vsyncadd [#allocation8], 4294967264 }
 0x3a2   :  { %247 = vsyncpa [#allocation4], 1 }
 0x3a3   :  { %248 = vsyncpa [#allocation5], 1 }
 0x3a4   :  { %249 = vsyncpa [#allocation8], 1 }

</bundles_post_ra>
